<compile_context>
chip_gen: v7x
topology: tpu7x:2x2x1
jax: 0.10.0
libtpu: 0.0.40
codegen_flags: <defaults>
</compile_context>

<pallas_src>
from functools import partial

import jax
import jax.numpy as jnp
from jax.experimental import pallas as pl
from jax.experimental.pallas import tpu as pltpu

LATENT_DIM = 2
N_HIDDEN_1 = 128
N_FEATURES = 28 * 28          # 784
N_FEATURES_PAD = 896          # 7 * 128 -> lane-dense MXU tile for fc4


def decoder_kernel(x_ref, w3_ref, b3_ref, w4_ref, b4_ref, o_ref):
    # ---- fc3 + sigmoid on the VPU (K=2 matmul is MXU-hostile) ----
    x = x_ref[...]                                    # (TB, 2)   f32
    w3 = w3_ref[...]                                  # (2, 128)  f32
    h = (x[:, 0:1] * w3[0:1, :]
         + x[:, 1:2] * w3[1:2, :]
         + b3_ref[...])                               # (TB, 128) f32
    h = jax.nn.sigmoid(h)

    # ---- fc4 on the MXU (f32 operands, f32 accumulate; MXU work is hidden
    #      under the HBM writeback, so keep full module fidelity) ----
    y = jnp.dot(h, w4_ref[...],
                preferred_element_type=jnp.float32)   # (TB, 896) f32 in VMEM

    # Epilogue (bias + sigmoid) and HBM store only on the real 784 columns.
    y = y[:, :N_FEATURES] + b4_ref[...]               # (TB, 784)
    o_ref[...] = jax.nn.sigmoid(y).astype(o_ref.dtype)


def prepare_decoder_params(w3_t, b3, w4_t, b4):
    """One-time parameter prep (hoisted out of the per-call path).

    w3_t: (2, 128), b3: (128,), w4_t: (128, 784), b4: (784,)  -- (in, out) layout.
    """
    w4_p = jnp.zeros((N_HIDDEN_1, N_FEATURES_PAD), jnp.float32)
    w4_p = w4_p.at[:, :N_FEATURES].set(w4_t.astype(jnp.float32))
    return (
        w3_t.astype(jnp.float32),                         # (2, 128)
        b3.reshape(1, N_HIDDEN_1).astype(jnp.float32),    # (1, 128)
        w4_p,                                             # (128, 896) zero-padded cols
        b4.reshape(1, N_FEATURES).astype(jnp.float32),    # (1, 784)
    )


@partial(jax.jit, static_argnames=("tb_max",))
def decoder_forward(x, params, *, tb_max=512):
    """x: (B, LATENT_DIM) f32. params: output of prepare_decoder_params."""
    w3_t, b3_r, w4_p, b4_r = params
    B = x.shape[0]

    # Batch tile: multiple of 8, capped at tb_max (~DMA roofline plateau, fits
    # every generation's default scoped VMEM), and sized so the grid has >= 2
    # steps whenever B > 8 (v7x megacore split + writeback/compute overlap).
    half = ((B + 1) // 2 + 7) // 8 * 8
    tb = max(8, min(tb_max, half))
    b_pad = ((B + tb - 1) // tb) * tb
    if b_pad != B:
        x = jnp.pad(x, ((0, b_pad - B), (0, 0)))

    weight_bytes = (LATENT_DIM * N_HIDDEN_1 + N_HIDDEN_1
                    + N_HIDDEN_1 * N_FEATURES_PAD + N_FEATURES) * 4

    out = pl.pallas_call(
        decoder_kernel,
        out_shape=jax.ShapeDtypeStruct((b_pad, N_FEATURES), jnp.float32),
        grid_spec=pltpu.PrefetchScalarGridSpec(
            num_scalar_prefetch=0,
            grid=(b_pad // tb,),
            in_specs=[
                pl.BlockSpec((tb, LATENT_DIM), lambda i: (i, 0)),              # x tile
                pl.BlockSpec((LATENT_DIM, N_HIDDEN_1), lambda i: (0, 0)),      # w3 resident
                pl.BlockSpec((1, N_HIDDEN_1), lambda i: (0, 0)),               # b3 resident
                pl.BlockSpec((N_HIDDEN_1, N_FEATURES_PAD), lambda i: (0, 0)),  # w4 resident
                pl.BlockSpec((1, N_FEATURES), lambda i: (0, 0)),               # b4 resident
            ],
            out_specs=pl.BlockSpec((tb, N_FEATURES), lambda i: (i, 0)),
        ),
        compiler_params=pltpu.CompilerParams(
            dimension_semantics=("parallel",),   # megacore split on v7x
        ),
        cost_estimate=pl.CostEstimate(
            flops=2 * b_pad * N_HIDDEN_1 * (LATENT_DIM + N_FEATURES),
            transcendentals=b_pad * (N_HIDDEN_1 + N_FEATURES),
            bytes_accessed=b_pad * (LATENT_DIM + N_FEATURES) * 4 + weight_bytes,
        ),
    )(x, w3_t, b3_r, w4_p, b4_r)

    if b_pad != B:
        out = out[:B]
    return out


def init_params(key):
    """Deterministic parameter init (shapes match nn.Linear in the module)."""
    k1, k2, k3, k4 = jax.random.split(key, 4)
    # PyTorch stores Linear weight as (out, in); we keep the transposed (in, out).
    w3_t = jax.random.normal(k1, (LATENT_DIM, N_HIDDEN_1), jnp.float32) * 0.1
    b3 = jax.random.normal(k2, (N_HIDDEN_1,), jnp.float32) * 0.1
    w4_t = jax.random.normal(k3, (N_HIDDEN_1, N_FEATURES), jnp.float32) * 0.1
    b4 = jax.random.normal(k4, (N_FEATURES,), jnp.float32) * 0.1
    return w3_t, b3, w4_t, b4


if __name__ == "__main__":
    key = jax.random.PRNGKey(0)
    k_x, k_p = jax.random.split(key)

    B = 64   # small, but enough for a 2-step grid (tb=32)
    x = jax.random.normal(k_x, (B, LATENT_DIM), jnp.float32)
    w3_t, b3, w4_t, b4 = init_params(k_p)

    params = prepare_decoder_params(w3_t, b3, w4_t, b4)
    out = decoder_forward(x, params)
    out = jax.block_until_ready(out)
    assert out.shape == (B, N_FEATURES)

    # Reference: the original module math in f32.
    ref = jax.nn.sigmoid(jax.nn.sigmoid(x @ w3_t + b3) @ w4_t + b4)
    assert jnp.allclose(out, ref, atol=2e-2, rtol=2e-2), \
        float(jnp.max(jnp.abs(out - ref)))

    print("KERNEL_OK")
</pallas_src>

<mosaic_0001>
module attributes {stable_mosaic.version = 11 : i64} {
  func.func @decoder_kernel(%arg0: i32, %arg1: memref<32x2xf32, #tpu.memory_space<vmem>>, %arg2: memref<2x128xf32, #tpu.memory_space<vmem>>, %arg3: memref<1x128xf32, #tpu.memory_space<vmem>>, %arg4: memref<128x896xf32, #tpu.memory_space<vmem>>, %arg5: memref<1x784xf32, #tpu.memory_space<vmem>>, %arg6: memref<32x784xf32, #tpu.memory_space<vmem>>) attributes {dimension_semantics = [#tpu.dimension_semantics<parallel>], iteration_bounds = array<i64: 2>, scalar_prefetch = 0 : i64, scratch_operands = 0 : i64, tpu.core_type = #tpu.core_type<tc>, window_params = [{transform_indices = @transform_0, window_bounds = array<i64: 32, 2>}, {pipeline_mode = #tpu.pipeline_mode<synchronous>, transform_indices = @transform_1, window_bounds = array<i64: 2, 128>}, {pipeline_mode = #tpu.pipeline_mode<synchronous>, transform_indices = @transform_2, window_bounds = array<i64: 1, 128>}, {pipeline_mode = #tpu.pipeline_mode<synchronous>, transform_indices = @transform_3, window_bounds = array<i64: 128, 896>}, {pipeline_mode = #tpu.pipeline_mode<synchronous>, transform_indices = @transform_4, window_bounds = array<i64: 1, 784>}, {transform_indices = @transform_5, window_bounds = array<i64: 32, 784>}]} {
    %c0 = arith.constant 0 : index
    %c0_0 = arith.constant 0 : index
    %0 = vector.load %arg1[%c0, %c0_0] : memref<32x2xf32, #tpu.memory_space<vmem>>, vector<32x2xf32>
    %c0_1 = arith.constant 0 : index
    %c0_2 = arith.constant 0 : index
    %1 = vector.load %arg2[%c0_1, %c0_2] : memref<2x128xf32, #tpu.memory_space<vmem>>, vector<2x128xf32>
    %2 = vector.extract_strided_slice %0 {offsets = [0, 0], sizes = [32, 1], strides = [1, 1]} : vector<32x2xf32> to vector<32x1xf32>
    %3 = vector.extract_strided_slice %1 {offsets = [0, 0], sizes = [1, 128], strides = [1, 1]} : vector<2x128xf32> to vector<1x128xf32>
    %4 = vector.broadcast %2 : vector<32x1xf32> to vector<32x128xf32>
    %5 = vector.broadcast %3 : vector<1x128xf32> to vector<32x128xf32>
    %6 = arith.mulf %4, %5 : vector<32x128xf32>
    %7 = vector.extract_strided_slice %0 {offsets = [0, 1], sizes = [32, 1], strides = [1, 1]} : vector<32x2xf32> to vector<32x1xf32>
    %8 = vector.extract_strided_slice %1 {offsets = [1, 0], sizes = [1, 128], strides = [1, 1]} : vector<2x128xf32> to vector<1x128xf32>
    %9 = vector.broadcast %7 : vector<32x1xf32> to vector<32x128xf32>
    %10 = vector.broadcast %8 : vector<1x128xf32> to vector<32x128xf32>
    %11 = arith.mulf %9, %10 : vector<32x128xf32>
    %12 = arith.addf %6, %11 : vector<32x128xf32>
    %c0_3 = arith.constant 0 : index
    %c0_4 = arith.constant 0 : index
    %13 = vector.load %arg3[%c0_3, %c0_4] : memref<1x128xf32, #tpu.memory_space<vmem>>, vector<1x128xf32>
    %14 = vector.broadcast %13 : vector<1x128xf32> to vector<32x128xf32>
    %15 = arith.addf %12, %14 : vector<32x128xf32>
    %16 = arith.negf %15 : vector<32x128xf32>
    %17 = math.exp %16 : vector<32x128xf32>
    %cst = arith.constant 1.000000e+00 : f32
    %18 = vector.broadcast %cst : f32 to vector<32x128xf32>
    %19 = arith.addf %18, %17 : vector<32x128xf32>
    %20 = arith.divf %18, %19 : vector<32x128xf32>
    %c0_5 = arith.constant 0 : index
    %c0_6 = arith.constant 0 : index
    %21 = vector.load %arg4[%c0_5, %c0_6] : memref<128x896xf32, #tpu.memory_space<vmem>>, vector<128x896xf32>
    %cst_7 = arith.constant dense<0.000000e+00> : vector<32x896xf32>
    %22 = tpu.matmul %20, %21, %cst_7 {dimension_numbers = #tpu.dot_dimension_numbers<[1], [0], [0], [1], [0, 0, 1, 1], [], []>} : vector<32x128xf32>, vector<128x896xf32>, vector<32x896xf32> -> vector<32x896xf32>
    %23 = vector.extract_strided_slice %22 {offsets = [0, 0], sizes = [32, 784], strides = [1, 1]} : vector<32x896xf32> to vector<32x784xf32>
    %c0_8 = arith.constant 0 : index
    %c0_9 = arith.constant 0 : index
    %24 = vector.load %arg5[%c0_8, %c0_9] : memref<1x784xf32, #tpu.memory_space<vmem>>, vector<1x784xf32>
    %25 = vector.broadcast %24 : vector<1x784xf32> to vector<32x784xf32>
    %26 = arith.addf %23, %25 : vector<32x784xf32>
    %27 = arith.negf %26 : vector<32x784xf32>
    %28 = math.exp %27 : vector<32x784xf32>
    %cst_10 = arith.constant 1.000000e+00 : f32
    %29 = vector.broadcast %cst_10 : f32 to vector<32x784xf32>
    %30 = arith.addf %29, %28 : vector<32x784xf32>
    %31 = arith.divf %29, %30 : vector<32x784xf32>
    %c0_11 = arith.constant 0 : index
    %c0_12 = arith.constant 0 : index
    %32 = vector.load %arg6[%c0_11, %c0_12] : memref<32x784xf32, #tpu.memory_space<vmem>>, vector<32x784xf32>
    tpu.vector_store %arg6[%c0_11, %c0_12], %31 {strides = array<i32>} : memref<32x784xf32, #tpu.memory_space<vmem>>, vector<32x784xf32>,
    return
  }
  func.func @transform_0(%arg0: i32) -> (i32, i32) {
    %c0_i32 = arith.constant 0 : i32
    %c0_i32_0 = arith.constant 0 : i32
    return %arg0, %c0_i32 : i32, i32
  }
  func.func @transform_1(%arg0: i32) -> (i32, i32) {
    %c0_i32 = arith.constant 0 : i32
    %c0_i32_0 = arith.constant 0 : i32
    %c0_i32_1 = arith.constant 0 : i32
    return %c0_i32, %c0_i32_0 : i32, i32
  }
  func.func @transform_2(%arg0: i32) -> (i32, i32) {
    %c0_i32 = arith.constant 0 : i32
    %c0_i32_0 = arith.constant 0 : i32
    %c0_i32_1 = arith.constant 0 : i32
    return %c0_i32, %c0_i32_0 : i32, i32
  }
  func.func @transform_3(%arg0: i32) -> (i32, i32) {
    %c0_i32 = arith.constant 0 : i32
    %c0_i32_0 = arith.constant 0 : i32
    %c0_i32_1 = arith.constant 0 : i32
    return %c0_i32, %c0_i32_0 : i32, i32
  }
  func.func @transform_4(%arg0: i32) -> (i32, i32) {
    %c0_i32 = arith.constant 0 : i32
    %c0_i32_0 = arith.constant 0 : i32
    %c0_i32_1 = arith.constant 0 : i32
    return %c0_i32, %c0_i32_0 : i32, i32
  }
  func.func @transform_5(%arg0: i32) -> (i32, i32) {
    %c0_i32 = arith.constant 0 : i32
    %c0_i32_0 = arith.constant 0 : i32
    return %arg0, %c0_i32 : i32, i32
  }
}

</mosaic_0001>

<bundles_post_ra>
// kernel: decoder_forward.1
= control target key start
LH: loop header
LB: loop body
LE: loop exit
PB: predicated region body
PF: predicated region fallthrough
CT: control target
= control target key end

     0   :  { %10 = vsyncpa [#allocation3], 0  ;;  %s1992_s0 = inlined_call_operand.vmem [shape: f32[64,2], index: 0, kind: input, shape index: {}]   ;;  %s1993_s1 = inlined_call_operand.vmem [shape: f32[2,128], index: 1, kind: input, shape index: {}]   ;;  %s1994_s2 = inlined_call_operand.vmem [shape: f32[1,128], index: 2, kind: input, shape index: {}]   ;;  %s1995_s3 = inlined_call_operand.hbm [shape: f32[128,896], index: 3, kind: input, shape index: {}]   ;;  %s1996_s4 = inlined_call_operand.vmem [shape: f32[1,784], index: 4, kind: input, shape index: {}]   ;;  %s1997_s5 = inlined_call_operand.hbm [shape: f32[64,784], index: 5, kind: output, shape index: {}]  }
   0x1   :  { %11 = vsyncpa [#allocation4], 0 }
   0x2   :  { %13 = vsyncpa [#allocation4 + $0x1], 0  ;;  %s1711_s18 = smov 0   ;;  %s1713_s19 = smov 0  }
   0x3   :  { %s1715_s20 = smov 0   ;;  %s1717_s21 = smov 0  }
   0x4 LB: > { %s1732_s22 = sadd.s32 4294967295, %s1670_s21   ;;  %s1152_s23 = sadd.s32 4294967294, %s1670_s21   ;;  %s1670_s21 = sphi %s1717_s21, %s2013_s21   ;;  %s1666_s20 = sphi %s1715_s20, %s2012_s20   ;;  %s1662_s19 = sphi %s1713_s19, %s2011_s19   ;;  %s1658_s18 = sphi %s1711_s18, %s2010_s18  }
   0x5   : > { %s1736_s24 = sadd.s32 1, %s1670_s21   ;;  %s136_s25 = sadd.s32 1, %s1666_s20 }
   0x6   : > { %s133_s26 = ssub.s32 %s1670_s21, %s1736_s24  ;;  %p146_p0 = scmp.ne.s32.totalorder %s1666_s20, %s1662_s19 }
   0x7   : > { %p134_p1 = scmp.eq.s32.totalorder %s133_s26, 0  ;;  %p147_p2 = scmp.eq.s32.totalorder %s1732_s22, 1 }
   0x8   : > { %p152_p3 = scmp.ne.s32.totalorder %s1662_s19, %s1658_s18  ;;  %p153_p4 = scmp.eq.s32.totalorder %s1152_s23, 1 }
   0x9   : > { %s1747_s27 = scalar_select %p134_p1, %s1666_s20, %s136_s25  }
   0xa   : > { %p1749_p5 = por %p147_p2, %p146_p0  ;;  %p1753_p6 = por %p153_p4, %p152_p3 }
   0xb   : > { %p1153_p7 = scmp.ge.s32.totalorder %s1670_s21, 1  ;;  %p160_p8 = scmp.lt.s32.totalorder %s1670_s21, 3 }
   0xc   : > { %s2001_s28 = scalar_select %p1749_p5, 1, 0 }
   0xd   : > { %s2002_s29 = scalar_select %p1753_p6, 1, 0 }
   0xe   : > { %p1998_p9 = scmp.eq.s32.totalorder %s1732_s22, 0  ;;  %p1760_p10 = pnand %p1153_p7, %p160_p8 }
   0xf   : > { %s1672_s6 = smov [#allocation2]   ;;  %s1576_s11 = scalar_lea.hbm %s1995_s3, 14336 }
  0x10   : > { %s2003_s30 = scalar_select %p1760_p10, 1, 0 }
  0x11   : > { %s178_s7 = sshll.u32 %s1672_s6, 4  ;;  %p1392_p11 = pneg %p1760_p10  ;;  %s179_s7 = int_to_ptr.vmem [resolvable:$true] %s178_s7 }
  0x12   : > { %p1577_p13 = scmp.ne.s32.totalorder %s1995_s3, %s1576_s11  ;;  %p1583_p3 = scmp.lt.u32.totalorder %s1576_s11, %s1995_s3 }
  0x13   : > { %p1768_p12 = pnand %p1998_p9, %p1392_p11 }
  0x15   : > { %p1578_p0 = pneg %p1768_p12 }
  0x17   : > { %p1579_p1 = pnand %p1578_p0, %p1577_p13 }
  0x19   : > { %p1580_p2 = pneg %p1579_p1 }
  0x1b   : > { %p1585_p4 = pnand %p1583_p3, %p1580_p2 }
  0x1d   : > { %1588 = shalt.err (!%p1585_p4)
}
  0x1e   : > { %s1589_s16 = scalar_lea.vmem %s179_s7, 14336  ;;  %p1597_p9 = scmp.lt.s32.totalorder %s179_s7, %s179_s7 }
  0x1f   : > { %p1590_p7 = scmp.ne.s32.totalorder %s179_s7, %s1589_s16  ;;  %p1598_p6 = scmp.lt.s32.totalorder %s1589_s16, %s1589_s16 }
  0x21   : > { %p1592_p8 = pnand %p1590_p7, %p1578_p0  ;;  %p1599_p5 = por %p1598_p6, %p1597_p9 }
  0x23   : > { %p1593_p11 = pneg %p1592_p8 }
  0x25   : > { %p1600_p10 = pnand %p1599_p5, %p1593_p11 }
  0x27   : > { %1603 = shalt.err (!%p1600_p10)
}
  0x28   : > { %s1673_s17 = smov 896   ;;  %s1674_s23 = smov 56  }
  0x29   : > { %1395 = dma.hbm_to_vmem [thread:$0]  (!%p1768_p12), %s1995_s3, 14336, %s179_s7, [#allocation3], %s1673_s17, %s1673_s17, %s1674_s23  }
  0x2a   : > { %p2005_p13 = scmp.ne.s32.totalorder %s2003_s30, 0 }
  0x2b   : > { %p2006_p1 = scmp.eq.s32.totalorder (!%p2005_p13), %s1732_s22, 0 }
  0x2c   : > { %206 = sbr.rel (%p2005_p13) target bundleno = 533 (0x215), region = 40 }
  0x33   : > { %1649 = dma.done.wait (%p2006_p1), [#allocation3], 14336   ;;  %p2007_p0 = pmov %p2006_p1 }
  0x34   : > { %s1158_s6 = sshll.u32 %s1732_s22, 2  ;;  %v1675_v0 = vmov 0   ;;  %v338_v3 = vld [vmem:[#allocation2 + $0x8] sm:$0xff]  ;;  %v345_v4 = vld [vmem:[#allocation2 + $0x40] sm:$0xff]  ;;  %v340_v5 = vld [vmem:[#allocation2 + $0x18] sm:$0xff]  ;;  %v1676_v14 = vmov 1  }
  0x35   : > { %1651 = vsyncadd (%p2007_p0), [#allocation3], 4294952960  ;;  %1445 = vset.pattern.permute.xlu1 %v1675_v0  ;;  %1443 = vset.pattern.permute.xlu0 %v1675_v0  ;;  %p235_p5 = scmp.lt.s32.totalorder %s1158_s6, 7  ;;  %v347_v6 = vld [vmem:[#allocation2 + $0x50] sm:$0xff]  ;;  %v1256_v7 = vpack.c.bf16 %v345_v4, %v338_v3  ;;  %v337_v9 = vld [vmem:[#allocation2] sm:$0xff]  ;;  %s231_s16 = sand.u32 1, %s1662_s19  }
  0x36   : > { %v1288_v8 = vpack.c.bf16 %v347_v6, %v340_v5  ;;  %v344_v10 = vld [vmem:[#allocation2 + $0x38] sm:$0xff]  ;;  %v339_v12 = vld [vmem:[#allocation2 + $0x10] sm:$0xff]  ;;  %v346_v13 = vld [vmem:[#allocation2 + $0x48] sm:$0xff]  ;;  %s1384_s17 = smul.u32 224, %s231_s16  ;;  %vm1040_vm0 = vcmask 130048   ;;  %s1951_s10 = scalar_lea.sflag [#allocation4], %s231_s16 }
  0x37   : > { %s2015_s6 = smov (!%p235_p5, %s1158_s6), 7  ;;  %v1258_v11 = vpack.c.bf16 %v344_v10, %v337_v9  ;;  %v1290_v16 = vpack.c.bf16 %v346_v13, %v339_v12  ;;  %v352_v17 = vld [vmem:[#allocation2 + $0x78] sm:$0xff]  ;;  %v359_v18 = vld [vmem:[#allocation2 + $0xb0] sm:$0xff]  ;;  %v354_v19 = vld [vmem:[#allocation2 + $0x88] sm:$0xff]  ;;  %1257 = vmatprep.subr.bf16.mxu0 %v1256_v7  ;;  %s1385_s25 = smul.u32 3584, %s1732_s22 }
  0x38   : > { %s1159_s8 = sshll.u32 %s2015_s6, 3  ;;  %1289 = vmatprep.subr.bf16.mxu1 %v1288_v8  ;;  %v1260_v20 = vpack.c.bf16 %v359_v18, %v352_v17  ;;  %v361_v21 = vld [vmem:[#allocation2 + $0xc0] sm:$0xff]  ;;  %v351_v22 = vld [vmem:[#allocation2 + $0x70] sm:$0xff]  ;;  %v358_v23 = vld [vmem:[#allocation2 + $0xa8] sm:$0xff]  ;;  %s1891_s23 = scalar_lea.vmem [#allocation5], %s1384_s17 }
  0x39   : > { %s1798_s7 = scalar_lea.vmem %s1992_s0, %s1159_s8  ;;  %1259 = vmatpush1.bf16.msra.mxu0 %v1258_v11  ;;  %1291 = vmatpush1.bf16.msra.mxu1 %v1290_v16  ;;  %v1292_v24 = vpack.c.bf16 %v361_v21, %v354_v19  ;;  %v1262_v25 = vpack.c.bf16 %v358_v23, %v351_v22  ;;  %v353_v26 = vld [vmem:[#allocation2 + $0x80] sm:$0xff]  ;;  %v360_v27 = vld [vmem:[#allocation2 + $0xb8] sm:$0xff]  ;;  %v366_v30 = vld [vmem:[#allocation2 + $0xe8] sm:$0xff]  ;;  %s1078_s26 = sshll.u32 %s1891_s23, 4  ;;  %s1940_s26 = int_to_ptr.vmem [resolvable:$true] %s1078_s26 }
  0x3a   : > { %v242_v1 = vld [vmem:[%s1798_s7 + $0x8] sm:$0xff]  ;;  %v241_v2 = vld [vmem:[%s1798_s7] sm:$0xff]  ;;  %v243_v15 = vld [vmem:[%s1798_s7 + $0x10] sm:$0xff]  ;;  %1261 = vmatprep.subr.bf16.mxu0 %v1260_v20  ;;  %v1294_v29 = vpack.c.bf16 %v360_v27, %v353_v26  ;;  %s1945_s9 = scalar_lea.hbm %s1997_s5, %s1385_s25  ;;  %p2008_p9 = scmp.ne.s32.totalorder %s2001_s28, 0 }
  0x3b   : > { %253 = vperm.xlu1 %1445, %v242_v1   ;;  %248 = vperm.xlu0 %1443, %v241_v2   ;;  %v244_v28 = vld [vmem:[%s1798_s7 + $0x18] sm:$0xff]  ;;  %v373_v31 = vld [vmem:[#allocation2 + $0x120] sm:$0xff]  ;;  %v375_v34 = vld [vmem:[#allocation2 + $0x130] sm:$0xff]  ;;  %s1604_s7 = scalar_lea.vmem %s1940_s26, 3584  ;;  %s1678_s22 = smov [#allocation5]  }
  0x3c   : > { %v368_v32 = vld [vmem:[#allocation2 + $0xf8] sm:$0xff]  ;;  %1293 = vmatprep.subr.bf16.mxu1 %v1292_v24  ;;  %v1264_v33 = vpack.c.bf16 %v373_v31, %v366_v30  ;;  %v365_v35 = vld [vmem:[#allocation2 + $0xe0] sm:$0xff]  ;;  %v367_v39 = vld [vmem:[#allocation2 + $0xf0] sm:$0xff]  ;;  %p1605_p6 = scmp.ne.s32.totalorder %s1940_s26, %s1604_s7  ;;  %s1608_s30 = sshll.u32 %s1678_s22, 4  ;;  %s1609_s30 = int_to_ptr.vmem [resolvable:$false] %s1608_s30 }
  0x3d   : > { %v372_v36 = vld [vmem:[#allocation2 + $0x118] sm:$0xff]  ;;  %1263 = vmatpush1.bf16.msra.mxu0 %v1262_v25  ;;  %1295 = vmatpush1.bf16.msra.mxu1 %v1294_v29  ;;  %v1296_v37 = vpack.c.bf16 %v375_v34, %v368_v32  ;;  %v374_v40 = vld [vmem:[#allocation2 + $0x128] sm:$0xff]  ;;  %v387_v43 = vld [vmem:[#allocation2 + $0x190] sm:$0xff]  ;;  %s1610_s11 = scalar_lea.vmem %s1609_s30, 7168  ;;  %p1611_p2 = scmp.lt.s32.totalorder %s1940_s26, %s1609_s30 }
  0x3e   : > { %v1266_v38 = vpack.c.bf16 %v372_v36, %v365_v35  ;;  %1265 = vmatprep.subr.bf16.mxu0 %v1264_v33  ;;  %v1298_v41 = vpack.c.bf16 %v374_v40, %v367_v39  ;;  %v380_v42 = vld [vmem:[#allocation2 + $0x158] sm:$0xff]  ;;  %v382_v44 = vld [vmem:[#allocation2 + $0x168] sm:$0xff]  ;;  %v389_v46 = vld [vmem:[#allocation2 + $0x1a0] sm:$0xff]  ;;  %p1606_p10 = pnand %p1605_p6, %p2008_p9  ;;  %p1612_p3 = scmp.lt.s32.totalorder %s1610_s11, %s1604_s7 }
  0x3f   : > { %1446 = vset.pattern.permute.xlu1 %v1676_v14  ;;  %1444 = vset.pattern.permute.xlu0 %v1676_v14  ;;  %v1268_v45 = vpack.c.bf16 %v387_v43, %v380_v42  ;;  %v379_v47 = vld [vmem:[#allocation2 + $0x150] sm:$0xff]  ;;  %v386_v48 = vld [vmem:[#allocation2 + $0x188] sm:$0xff]  ;;  %v1300_v49 = vpack.c.bf16 %v389_v46, %v382_v44  ;;  %v381_v51 = vld [vmem:[#allocation2 + $0x160] sm:$0xff]  ;;  %v1677_v44 = vmov 0.0  }
  0x40   : > { %279 = vperm.xlu1 %1446, %v242_v1   ;;  %275 = vperm.xlu0 %1444, %v241_v2   ;;  %v1270_v50 = vpack.c.bf16 %v386_v48, %v379_v47  ;;  %v388_v52 = vld [vmem:[#allocation2 + $0x198] sm:$0xff]  ;;  %v394_v54 = vld [vmem:[#allocation2 + $0x1c8] sm:$0xff]  ;;  %v401_v55 = vld [vmem:[#allocation2 + $0x200] sm:$0xff]  ;;  %p1607_p12 = pneg %p1606_p10  ;;  %p1613_p4 = por %p1612_p3, %p1611_p2 }
  0x41   : > { %1297 = vmatprep.subr.bf16.mxu1 %v1296_v37  ;;  %1267 = vmatpush1.bf16.msra.mxu0 %v1266_v38  ;;  %v1302_v53 = vpack.c.bf16 %v388_v52, %v381_v51  ;;  %v396_v56 = vld [vmem:[#allocation2 + $0x1d8] sm:$0xff]  ;;  %v1272_v57 = vpack.c.bf16 %v401_v55, %v394_v54  ;;  %v403_v58 = vld [vmem:[#allocation2 + $0x210] sm:$0xff]  ;;  %v393_v59 = vld [vmem:[#allocation2 + $0x1c0] sm:$0xff] }
  0x42   : > { %1299 = vmatpush1.bf16.msra.mxu1 %v1298_v41  ;;  %1269 = vmatprep.subr.bf16.mxu0 %v1268_v45  ;;  %v400_v60 = vld [vmem:[#allocation2 + $0x1f8] sm:$0xff]  ;;  %v1304_v61 = vpack.c.bf16 %v403_v58, %v396_v56  ;;  %v395_v63 = vld [vmem:[#allocation2 + $0x1d0] sm:$0xff]  ;;  %v410_v4 = vld [vmem:[#allocation2 + $0x248] sm:$0xff]  ;;  %v266_v45 = vlaneseq  ;;  %p1614_p7 = pnand %p1613_p4, %p1607_p12 }
  0x43   : > { %1301 = vmatprep.subr.bf16.mxu1 %v1300_v49  ;;  %v1274_v62 = vpack.c.bf16 %v400_v60, %v393_v59  ;;  %v408_v2 = vld [vmem:[#allocation2 + $0x238] sm:$0xff]  ;;  %v415_v3 = vld [vmem:[#allocation2 + $0x270] sm:$0xff]  ;;  %v417_v6 = vld [vmem:[#allocation2 + $0x280] sm:$0xff]  ;;  %513 = vmatprep.mubr.f32.mxu0 %v1677_v44 }
  0x44   : > { %1447 = vset.pattern.permute.xlu1 %v1675_v0  ;;  %283 = vperm.xlu0 %1444, %v243_v15   ;;  %v402_v0 = vld [vmem:[#allocation2 + $0x208] sm:$0xff]  ;;  %v1276_v5 = vpack.c.bf16 %v415_v3, %v408_v2  ;;  %v407_v7 = vld [vmem:[#allocation2 + $0x230] sm:$0xff]  ;;  %v1308_v9 = vpack.c.bf16 %v417_v6, %v410_v4  ;;  %v409_v11 = vld [vmem:[#allocation2 + $0x240] sm:$0xff]  ;;  %v1809_v46 = vshrl.u32 %v266_v45, 7 }
  0x45   : > { %258 = vperm.xlu1 %1447, %v243_v15   ;;  %1271 = vmatpush1.bf16.msra.mxu0 %v1270_v50  ;;  %v1306_v1 = vpack.c.bf16 %v402_v0, %v395_v63  ;;  %v414_v8 = vld [vmem:[#allocation2 + $0x268] sm:$0xff]  ;;  %v416_v12 = vld [vmem:[#allocation2 + $0x278] sm:$0xff]  ;;  %v429_v15 = vld [vmem:[#allocation2 + $0x2e0] sm:$0xff] }
  0x46   : > { %1303 = vmatpush1.bf16.msra.mxu1 %v1302_v53  ;;  %1273 = vmatprep.subr.bf16.mxu0 %v1272_v57  ;;  %v1278_v10 = vpack.c.bf16 %v414_v8, %v407_v7  ;;  %v1310_v13 = vpack.c.bf16 %v416_v12, %v409_v11  ;;  %v422_v14 = vld [vmem:[#allocation2 + $0x2a8] sm:$0xff]  ;;  %v424_v16 = vld [vmem:[#allocation2 + $0x2b8] sm:$0xff]  ;;  %v431_v18 = vld [vmem:[#allocation2 + $0x2f0] sm:$0xff]  ;;  %v268_v47 = vsub.s32 0, %v1809_v46  ;;  %v292_v48 = vsub.s32 1, %v1809_v46 }
  0x47   : > { %1305 = vmatprep.subr.bf16.mxu1 %v1304_v61  ;;  %v1280_v17 = vpack.c.bf16 %v429_v15, %v422_v14  ;;  %v421_v19 = vld [vmem:[#allocation2 + $0x2a0] sm:$0xff]  ;;  %v428_v20 = vld [vmem:[#allocation2 + $0x2d8] sm:$0xff]  ;;  %v1312_v21 = vpack.c.bf16 %v431_v18, %v424_v16  ;;  %v423_v23 = vld [vmem:[#allocation2 + $0x2b0] sm:$0xff]  ;;  %602 = vmatprep.mubr.f32.mxu1 %v1677_v44 }
  0x48   : > { %287 = vperm.xlu0 %1444, %v244_v28   ;;  %v1282_v22 = vpack.c.bf16 %v428_v20, %v421_v19  ;;  %v430_v24 = vld [vmem:[#allocation2 + $0x2e8] sm:$0xff]  ;;  %v436_v26 = vld [vmem:[#allocation2 + $0x318] sm:$0xff]  ;;  %v443_v27 = vld [vmem:[#allocation2 + $0x350] sm:$0xff] }
  0x49   : > { %263 = vperm.xlu1 %1447, %v244_v28   ;;  %1275 = vmatpush1.bf16.msra.mxu0 %v1274_v62  ;;  %v1314_v25 = vpack.c.bf16 %v430_v24, %v423_v23  ;;  %v438_v28 = vld [vmem:[#allocation2 + $0x328] sm:$0xff]  ;;  %v1284_v29 = vpack.c.bf16 %v443_v27, %v436_v26  ;;  %v445_v30 = vld [vmem:[#allocation2 + $0x360] sm:$0xff]  ;;  %v435_v31 = vld [vmem:[#allocation2 + $0x310] sm:$0xff] }
  0x4a   : > { %1307 = vmatpush1.bf16.msra.mxu1 %v1306_v1  ;;  %1277 = vmatprep.subr.bf16.mxu0 %v1276_v5  ;;  %v442_v32 = vld [vmem:[#allocation2 + $0x348] sm:$0xff]  ;;  %v1316_v33 = vpack.c.bf16 %v445_v30, %v438_v28  ;;  %v437_v35 = vld [vmem:[#allocation2 + $0x320] sm:$0xff]  ;;  %v444_v36 = vld [vmem:[#allocation2 + $0x358] sm:$0xff] }
  0x4b   : > { %1309 = vmatprep.subr.bf16.mxu1 %v1308_v9  ;;  %v1286_v34 = vpack.c.bf16 %v442_v32, %v435_v31  ;;  %v1318_v37 = vpack.c.bf16 %v444_v36, %v437_v35  ;;  %v342_v38 = vld [vmem:[#allocation2 + $0x28] sm:$0xff]  ;;  %v349_v39 = vld [vmem:[#allocation2 + $0x60] sm:$0xff]  ;;  %v343_v40 = vld [vmem:[#allocation2 + $0x30] sm:$0xff] }
  0x4c   : > { %v1320_v41 = vpack.c.bf16 %v349_v39, %v342_v38  ;;  %v350_v42 = vld [vmem:[#allocation2 + $0x68] sm:$0xff]  ;;  %v245_v49 = vld [vmem:[%s1993_s1] sm:$0x3]  ;;  %v348_v24 = vld [vmem:[#allocation2 + $0x58] sm:$0xff] }
  0x4d   : > { %1279 = vmatpush1.bf16.msra.mxu0 %v1278_v10  ;;  %v1804_v43 = vpack.c.bf16 %v350_v42, %v343_v40  ;;  %v269_v52 = vrot.slane %v245_v49, %v268_v47  ;;  %v293_v53 = vrot.slane %v245_v49, %v292_v48  ;;  %v1160_v60 = vld [vmem:[%s1994_s2] ss:$0 sm:$0xff]  ;;  %v356_v26 = vld [vmem:[#allocation2 + $0x98] sm:$0xff]  ;;  %v363_v27 = vld [vmem:[#allocation2 + $0xd0] sm:$0xff] }
  0x4e   : > { %1311 = vmatpush1.bf16.msra.mxu1 %v1310_v13  ;;  %1281 = vmatprep.subr.bf16.mxu0 %v1280_v17  ;;  %v341_v23 = vld [vmem:[#allocation2 + $0x20] sm:$0xff]  ;;  %v355_v32 = vld [vmem:[#allocation2 + $0x90] sm:$0xff]  ;;  %v1324_v35 = vpack.c.bf16 %v363_v27, %v356_v26  ;;  %v378_v40 = vld [vmem:[#allocation2 + $0x148] sm:$0xff] }
  0x4f   : > { %1313 = vmatprep.subr.bf16.mxu1 %v1312_v21  ;;  %v357_v28 = vld [vmem:[#allocation2 + $0xa0] sm:$0xff]  ;;  %v1322_v31 = vpack.c.bf16 %v348_v24, %v341_v23  ;;  %v371_v39 = vld [vmem:[#allocation2 + $0x110] sm:$0xff]  ;;  %v376_v49 = vld [vmem:[#allocation2 + $0x138] sm:$0xff] }
  0x50   : > { %v377_v38 = vld [vmem:[#allocation2 + $0x140] sm:$0xff]  ;;  %v432_v24 = vld [vmem:[#allocation2 + $0x2f8] sm:$0xff]  ;;  %v447_v26 = vld [vmem:[#allocation2 + $0x370] sm:$0xff] }
  0x51   : > { %1283 = vmatpush1.bf16.msra.mxu0 %v1282_v22  ;;  %v369_v45 = vld [vmem:[#allocation2 + $0x100] sm:$0xff] }
  0x52   : > { %1315 = vmatpush1.bf16.msra.mxu1 %v1314_v25  ;;  %1285 = vmatprep.subr.bf16.mxu0 %v1284_v29  ;;  %v364_v29 = vld [vmem:[#allocation2 + $0xd8] sm:$0xff]  ;;  %v425_v23 = vld [vmem:[#allocation2 + $0x2c0] sm:$0xff] }
  0x53   : > { %1317 = vmatprep.subr.bf16.mxu1 %v1316_v33  ;;  %v362_v33 = vld [vmem:[#allocation2 + $0xc8] sm:$0xff]  ;;  %v1356_v36 = vpack.c.bf16 %v364_v29, %v357_v28  ;;  %v441_v27 = vld [vmem:[#allocation2 + $0x340] sm:$0xff]  ;;  %v448_v28 = vld [vmem:[#allocation2 + $0x378] sm:$0xff]  ;;  %v1346_v29 = vpack.c.bf16 %v432_v24, %v425_v23 }
  0x54   : > { %v1326_v42 = vpack.c.bf16 %v362_v33, %v355_v32  ;;  %v439_v32 = vld [vmem:[#allocation2 + $0x330] sm:$0xff]  ;;  %v446_v33 = vld [vmem:[#allocation2 + $0x368] sm:$0xff] }
  0x55   : > { %1287 = vmatpush1.bf16.msra.mxu0 %v1286_v34 }
  0x56   : > { %1319 = vmatpush1.bf16.msra.mxu1 %v1318_v37  ;;  %1321 = vmatprep.subr.bf16.mxu0 %v1320_v41  ;;  %v370_v37 = vld [vmem:[#allocation2 + $0x108] sm:$0xff] }
  0x57   : > { %1353 = vmatprep.subr.bf16.mxu1 %v1804_v43 }
  0xba   : > { %v249_v50 = vpop.permute.xlu0 %248  ;;  %v254_v51 = vpop.permute.xlu1 %253 }
  0xbb   : > { %v271_v54 = vmul.f32 %v269_v52, %v254_v51  ;;  %v270_v57 = vmul.f32 %v269_v52, %v249_v50  ;;  %v1328_v50 = vpack.c.bf16 %v377_v38, %v370_v37  ;;  %v1360_v51 = vpack.c.bf16 %v378_v40, %v371_v39 }
  0xbc   : > { %v817_v37 = vsub.s32 3, %v1809_v46 }
  0xbf   : > { %v276_v55 = vpop.permute.xlu0 %275  ;;  %v280_v56 = vpop.permute.xlu1 %279 }
  0xc0   : > { %v294_v58 = vmul.f32 %v293_v53, %v276_v55  ;;  %v295_v59 = vmul.f32 %v293_v53, %v280_v56  ;;  %v392_v55 = vld [vmem:[#allocation2 + $0x1b8] sm:$0xff]  ;;  %v383_v56 = vld [vmem:[#allocation2 + $0x170] sm:$0xff] }
  0xc2   : > { %v298_v61 = vadd.f32 %v294_v58, %v270_v57  ;;  %v299_v62 = vadd.f32 %v295_v59, %v271_v54  ;;  %v385_v54 = vld [vmem:[#allocation2 + $0x180] sm:$0xff]  ;;  %v390_v57 = vld [vmem:[#allocation2 + $0x1a8] sm:$0xff] }
  0xc3   : > { %v284_v63 = vpop.permute.xlu0 %283 }
  0xc4   : > { %v309_v0 = vadd.f32 %v1160_v60, %v298_v61  ;;  %v310_v1 = vadd.f32 %v1160_v60, %v299_v62  ;;  %v296_v2 = vmul.f32 %v293_v53, %v284_v63  ;;  %v259_v3 = vpop.permute.xlu1 %258  ;;  %v398_v61 = vld [vmem:[#allocation2 + $0x1e8] sm:$0xff]  ;;  %v405_v62 = vld [vmem:[#allocation2 + $0x220] sm:$0xff]  ;;  %v399_v63 = vld [vmem:[#allocation2 + $0x1f0] sm:$0xff] }
  0xc5   : > { %v272_v4 = vmul.f32 %v269_v52, %v259_v3  ;;  %v397_v3 = vld [vmem:[#allocation2 + $0x1e0] sm:$0xff] }
  0xc6   : > { %v1161_v5 = vmul.f32 -1.442695, %v309_v0  ;;  %v1162_v6 = vmul.f32 -1.442695, %v310_v1  ;;  %v406_v0 = vld [vmem:[#allocation2 + $0x228] sm:$0xff]  ;;  %v1334_v1 = vpack.c.bf16 %v390_v57, %v383_v56 }
  0xc7   : > { %v300_v7 = vadd.f32 %v296_v2, %v272_v4  ;;  %v288_v8 = vpop.permute.xlu0 %287  ;;  %v1336_v2 = vpack.c.bf16 %v405_v62, %v398_v61  ;;  %v404_v4 = vld [vmem:[#allocation2 + $0x218] sm:$0xff] }
  0xc8   : > { %1448 = vpow2.f32 %v1161_v5  ;;  %v297_v9 = vmul.f32 %v293_v53, %v288_v8  ;;  %v264_v10 = vpop.permute.xlu1 %263  ;;  %v391_v53 = vld [vmem:[#allocation2 + $0x1b0] sm:$0xff]  ;;  %v412_v5 = vld [vmem:[#allocation2 + $0x258] sm:$0xff] }
  0xc9   : > { %1450 = vpow2.f32 %v1162_v6  ;;  %v311_v11 = vadd.f32 %v1160_v60, %v300_v7  ;;  %v273_v12 = vmul.f32 %v269_v52, %v264_v10  ;;  %v384_v52 = vld [vmem:[#allocation2 + $0x178] sm:$0xff]  ;;  %v1368_v7 = vpack.c.bf16 %v406_v0, %v399_v63  ;;  %v419_v8 = vld [vmem:[#allocation2 + $0x290] sm:$0xff] }
  0xca   : > { %v1332_v59 = vpack.c.bf16 %v391_v53, %v384_v52  ;;  %v420_v10 = vld [vmem:[#allocation2 + $0x298] sm:$0xff] }
  0xcb   : > { %v1163_v13 = vmul.f32 -1.442695, %v311_v11  ;;  %v301_v14 = vadd.f32 %v297_v9, %v273_v12  ;;  %v413_v9 = vld [vmem:[#allocation2 + $0x260] sm:$0xff]  ;;  %v1338_v11 = vpack.c.bf16 %v404_v4, %v397_v3  ;;  %v1340_v12 = vpack.c.bf16 %v419_v8, %v412_v5 }
  0xcd   : > { %1452 = vpow2.f32 %v1163_v13  ;;  %v312_v15 = vadd.f32 %v1160_v60, %v301_v14  ;;  %v1364_v60 = vpack.c.bf16 %v392_v55, %v385_v54  ;;  %v1372_v13 = vpack.c.bf16 %v420_v10, %v413_v9  ;;  %v411_v14 = vld [vmem:[#allocation2 + $0x250] sm:$0xff] }
  0xcf   : > { %v1164_v16 = vmul.f32 -1.442695, %v312_v15  ;;  %v418_v15 = vld [vmem:[#allocation2 + $0x288] sm:$0xff] }
  0xd1   : > { %1454 = vpow2.f32 %v1164_v16  ;;  %v426_v16 = vld [vmem:[#allocation2 + $0x2c8] sm:$0xff] }
  0xd2   : > { %v1449_v17 = vpop.eup %1448 }
  0xd3   : > { %v1451_v18 = vpop.eup %1450  ;;  %v325_v19 = vadd.f32 1.0, %v1449_v17  ;;  %v433_v17 = vld [vmem:[#allocation2 + $0x300] sm:$0xff] }
  0xd4   : > { %v326_v20 = vadd.f32 1.0, %v1451_v18  ;;  %v427_v18 = vld [vmem:[#allocation2 + $0x2d0] sm:$0xff] }
  0xd5   : > { %1456 = vrcp.f32 %v325_v19  ;;  %v434_v19 = vld [vmem:[#allocation2 + $0x308] sm:$0xff] }
  0xd6   : > { %1458 = vrcp.f32 %v326_v20  ;;  %v1342_v20 = vpack.c.bf16 %v418_v15, %v411_v14 }
  0xd7   : > { %v1453_v21 = vpop.eup %1452 }
  0xd8   : > { %v327_v22 = vadd.f32 1.0, %v1453_v21  ;;  %v1344_v21 = vpack.c.bf16 %v433_v17, %v426_v16 }
  0xda   : > { %1460 = vrcp.f32 %v327_v22  ;;  %v1376_v22 = vpack.c.bf16 %v434_v19, %v427_v18 }
  0xdb   : > { %v1455_v25 = vpop.eup %1454 }
  0xdc   : > { %v328_v30 = vadd.f32 1.0, %v1455_v25  ;;  %v440_v25 = vld [vmem:[#allocation2 + $0x338] sm:$0xff] }
  0xde   : > { %1462 = vrcp.f32 %v328_v30  ;;  %v1348_v30 = vpack.c.bf16 %v447_v26, %v440_v25 }
  0xdf   : > { %v1823_v34 = vpop.eup %1456 }
  0xe0   : > { %514 = vmatmul.mubr.f32.vlgmr.msra.gmra.mrb[0].mxu0 %v1823_v34  ;;  %603 = vmatmul.mubr.f32.vlgmr.msra.gmra.mrb[0].mxu1 %v1823_v34  ;;  %v1827_v41 = vpop.eup %1458 }
  0xe1   : > { %1323 = vmatpush1.bf16.msra.mxu0 %v1322_v31  ;;  %1355 = vmatpush3.bf16.msra.mxu1 %v1804_v43  ;;  %v1330_v43 = vpack.c.bf16 %v376_v49, %v369_v45  ;;  %v1380_v31 = vpack.c.bf16 %v448_v28, %v441_v27 }
  0xe2   : > { %519 = vmatprep.mubr.f32.mxu0 %v1677_v44  ;;  %608 = vmatprep.mubr.f32.mxu1 %v1677_v44 }
  0xe3   : > { %1325 = vmatprep.subr.bf16.mxu0 %v1324_v35  ;;  %1357 = vmatprep.subr.bf16.mxu1 %v1356_v36  ;;  %v1350_v35 = vpack.c.bf16 %v446_v33, %v439_v32 }
  0xe4   : > { %520 = vmatmul.mubr.f32.gmra.mrb[2].mxu0 %v1827_v41  ;;  %609 = vmatmul.mubr.f32.gmra.mrb[2].mxu1 %v1827_v41  ;;  %v1836_v58 = vpop.eup %1460 }
  0xe5   : > { %1327 = vmatpush1.bf16.msra.mxu0 %v1326_v42  ;;  %1359 = vmatpush3.bf16.msra.mxu1 %v1356_v36  ;;  %v813_v36 = vsub.s32 2, %v1809_v46 }
  0xe6   : > { %525 = vmatprep.mubr.f32.mxu0 %v1677_v44  ;;  %614 = vmatprep.mubr.f32.mxu1 %v1677_v44 }
  0xe7   : > { %1329 = vmatprep.subr.bf16.mxu0 %v1328_v50  ;;  %1361 = vmatprep.subr.bf16.mxu1 %v1360_v51 }
  0xe8   : > { %526 = vmatmul.mubr.f32.gmra.mrb[4].mxu0 %v1836_v58  ;;  %615 = vmatmul.mubr.f32.gmra.mrb[4].mxu1 %v1836_v58  ;;  %v1463_v6 = vpop.eup %1462 }
  0xe9   : > { %1331 = vmatpush1.bf16.msra.mxu0 %v1330_v43  ;;  %1363 = vmatpush3.bf16.msra.mxu1 %v1360_v51 }
  0xea   : > { %531 = vmatprep.mubr.f32.mxu0 %v1677_v44  ;;  %620 = vmatprep.mubr.f32.mxu1 %v1677_v44 }
  0xeb   : > { %1333 = vmatprep.subr.bf16.mxu0 %v1332_v59  ;;  %1365 = vmatprep.subr.bf16.mxu1 %v1364_v60 }
  0xec   : > { %532 = vmatmul.mubr.f32.gmra.mrb[6].mxu0 %v1463_v6  ;;  %621 = vmatmul.mubr.f32.gmra.mrb[6].mxu1 %v1463_v6 }
  0xed   : > { %1335 = vmatpush1.bf16.msra.mxu0 %v1334_v1  ;;  %1367 = vmatpush3.bf16.msra.mxu1 %v1364_v60 }
  0xee   : > { %1250 = vmatprep.mubr.f32.mxu1 %v1823_v34  ;;  %1337 = vmatprep.subr.bf16.mxu0 %v1336_v2 }
  0xef   : > { %1369 = vmatprep.subr.bf16.mxu1 %v1368_v7  ;;  %691 = vmatprep.mubr.f32.mxu0 %v1677_v44 }
  0xf1   : > { %1339 = vmatpush1.bf16.msra.mxu0 %v1338_v11  ;;  %1371 = vmatpush3.bf16.msra.mxu1 %v1368_v7 }
  0xf2   : > { %1341 = vmatprep.subr.bf16.mxu0 %v1340_v12  ;;  %1373 = vmatprep.subr.bf16.mxu1 %v1372_v13 }
  0xf5   : > { %1343 = vmatpush1.bf16.msra.mxu0 %v1342_v20  ;;  %1375 = vmatpush3.bf16.msra.mxu1 %v1372_v13 }
  0xf6   : > { %1345 = vmatprep.subr.bf16.mxu0 %v1344_v21  ;;  %1377 = vmatprep.subr.bf16.mxu1 %v1376_v22 }
  0xf9   : > { %1347 = vmatpush1.bf16.msra.mxu0 %v1346_v29  ;;  %1379 = vmatpush3.bf16.msra.mxu1 %v1376_v22 }
  0xfa   : > { %1349 = vmatprep.subr.bf16.mxu0 %v1348_v30  ;;  %1381 = vmatprep.subr.bf16.mxu1 %v1380_v31 }
  0xfd   : > { %1351 = vmatpush1.bf16.msra.mxu0 %v1350_v35  ;;  %1383 = vmatpush3.bf16.msra.mxu1 %v1380_v31 }
 0x100   : > { %692 = vmatmul.mubr.f32.vlgmr.msra.gmra.mrb[8].mxu0 %v1823_v34  ;;  %1251 = vmatmul.mubr.f32.vlgmr.msra.gmra.mrb[8].mxu1 %v1827_v41  ;;  %v1856_v34 = vld [vmem:[%s1996_s4] sm:$0x7f] }
 0x101   : > { %1253 = vmatprep.mubr.f32.mxu1 %v1836_v58  ;;  %697 = vmatprep.mubr.f32.mxu0 %v1677_v44  ;;  %v806_v38 = vrot.slane %v1856_v34, %v268_v47  ;;  %v1863_v39 = vrot.slane %v1856_v34, %v813_v36  ;;  %v1871_v40 = vrot.slane %v1856_v34, %v817_v37 }
 0x104   : > { %698 = vmatmul.mubr.f32.gmra.mrb[10].mxu0 %v1827_v41  ;;  %1254 = vmatmul.mubr.f32.gmra.mrb[10].mxu1 %v1463_v6 }
 0x105   : > { %703 = vmatprep.mubr.f32.mxu0 %v1677_v44 }
 0x108   : > { %704 = vmatmul.mubr.f32.gmra.mrb[12].mxu0 %v1836_v58 }
 0x109   : > { %709 = vmatprep.mubr.f32.mxu0 %v1677_v44  ;;  %v1868_v44 = vrot.slane %v1856_v34, %v292_v48 }
 0x10c   : > { %710 = vmatmul.mubr.f32.gmra.mrb[14].mxu0 %v1463_v6 }
 0x1b3   : > { %v515_v41 = vpop.f32.mrb[0].mxu0  ;;  %v604_v42 = vpop.f32.mrb[0].mxu1 }
 0x1b4   : > { %v838_v45 = vadd.f32 %v806_v38, %v515_v41  ;;  %v840_v49 = vadd.f32 %v1863_v39, %v604_v42  ;;  %v517_v50 = vpop.f32.mrb[1].mxu0  ;;  %v606_v51 = vpop.f32.mrb[1].mxu1 }
 0x1b5   : > { %v839_v47 = vadd.f32 %v1868_v44, %v517_v50  ;;  %v841_v52 = vadd.f32 %v1871_v40, %v606_v51  ;;  %v821_v50 = vsub.s32 4, %v1809_v46 }
 0x1b6   : > { %v1165_v53 = vmul.f32 -1.442695, %v838_v45  ;;  %v1167_v54 = vmul.f32 -1.442695, %v840_v49 }
 0x1b7   : > { %v1166_v55 = vmul.f32 -1.442695, %v839_v47  ;;  %v1168_v43 = vmul.f32 -1.442695, %v841_v52  ;;  %v521_v48 = vpop.f32.mrb[2].mxu0  ;;  %v610_v56 = vpop.f32.mrb[2].mxu1 }
 0x1b8   : > { %1464 = vpow2.f32 %v1165_v53  ;;  %v845_v57 = vadd.f32 %v806_v38, %v521_v48  ;;  %v847_v58 = vadd.f32 %v1863_v39, %v610_v56  ;;  %v523_v59 = vpop.f32.mrb[3].mxu0  ;;  %v612_v60 = vpop.f32.mrb[3].mxu1  ;;  %v829_v53 = vsub.s32 6, %v1809_v46 }
 0x1b9   : > { %1466 = vpow2.f32 %v1167_v54  ;;  %v846_v61 = vadd.f32 %v1868_v44, %v523_v59  ;;  %v848_v62 = vadd.f32 %v1871_v40, %v612_v60 }
 0x1ba   : > { %1468 = vpow2.f32 %v1166_v55  ;;  %v1172_v63 = vmul.f32 -1.442695, %v845_v57  ;;  %v1174_v0 = vmul.f32 -1.442695, %v847_v58  ;;  %v830_v60 = vrot.slane %v1856_v34, %v829_v53 }
 0x1bb   : > { %1470 = vpow2.f32 %v1168_v43  ;;  %v1173_v1 = vmul.f32 -1.442695, %v846_v61  ;;  %v1175_v2 = vmul.f32 -1.442695, %v848_v62  ;;  %v527_v3 = vpop.f32.mrb[4].mxu0  ;;  %v616_v4 = vpop.f32.mrb[4].mxu1 }
 0x1bc   : > { %1472 = vpow2.f32 %v1172_v63  ;;  %v852_v5 = vadd.f32 %v806_v38, %v527_v3  ;;  %v854_v6 = vadd.f32 %v1863_v39, %v616_v4  ;;  %v529_v7 = vpop.f32.mrb[5].mxu0  ;;  %v618_v8 = vpop.f32.mrb[5].mxu1  ;;  %v825_v43 = vsub.s32 5, %v1809_v46 }
 0x1bd   : > { %1474 = vpow2.f32 %v1174_v0  ;;  %v853_v9 = vadd.f32 %v1868_v44, %v529_v7  ;;  %v855_v10 = vadd.f32 %v1871_v40, %v618_v8  ;;  %v1895_v46 = vrot.slane %v1856_v34, %v821_v50 }
 0x1be   : > { %1476 = vpow2.f32 %v1173_v1  ;;  %v1179_v11 = vmul.f32 -1.442695, %v852_v5  ;;  %v1181_v12 = vmul.f32 -1.442695, %v854_v6  ;;  %v1900_v62 = vrot.slane %v1856_v34, %v825_v43 }
 0x1bf   : > { %1478 = vpow2.f32 %v1175_v2  ;;  %v1180_v13 = vmul.f32 -1.442695, %v853_v9  ;;  %v1182_v14 = vmul.f32 -1.442695, %v855_v10  ;;  %v533_v15 = vpop.f32.mrb[6].mxu0  ;;  %v622_v16 = vpop.f32.mrb[6].mxu1 }
 0x1c0   : > { %1480 = vpow2.f32 %v1179_v11  ;;  %v859_v17 = vadd.f32 %v806_v38, %v533_v15  ;;  %v535_v18 = vpop.f32.mrb[7].mxu0  ;;  %v624_v19 = vpop.f32.mrb[7].mxu1  ;;  %v861_v41 = vadd.f32 %v1863_v39, %v622_v16 }
 0x1c1   : > { %1482 = vpow2.f32 %v1181_v12  ;;  %v860_v49 = vadd.f32 %v1868_v44, %v535_v18  ;;  %v862_v52 = vadd.f32 %v1871_v40, %v624_v19 }
 0x1c2   : > { %v1465_v20 = vpop.eup %1464  ;;  %1484 = vpow2.f32 %v1180_v13  ;;  %v1186_v21 = vmul.f32 -1.442695, %v859_v17  ;;  %v1188_v56 = vmul.f32 -1.442695, %v861_v41 }
 0x1c3   : > { %v1467_v22 = vpop.eup %1466  ;;  %v950_v23 = vadd.f32 1.0, %v1465_v20  ;;  %1486 = vpow2.f32 %v1182_v14  ;;  %v1187_v58 = vmul.f32 -1.442695, %v860_v49  ;;  %v1189_v40 = vmul.f32 -1.442695, %v862_v52 }
 0x1c4   : > { %v1469_v24 = vpop.eup %1468  ;;  %v952_v25 = vadd.f32 1.0, %v1467_v22  ;;  %1488 = vpow2.f32 %v1186_v21 }
 0x1c5   : > { %v1471_v26 = vpop.eup %1470  ;;  %1490 = vrcp.f32 %v950_v23  ;;  %v951_v27 = vadd.f32 1.0, %v1469_v24 }
 0x1c6   : > { %v1473_v28 = vpop.eup %1472  ;;  %1492 = vrcp.f32 %v952_v25  ;;  %v953_v29 = vadd.f32 1.0, %v1471_v26 }
 0x1c7   : > { %v1475_v30 = vpop.eup %1474  ;;  %1494 = vrcp.f32 %v951_v27  ;;  %v957_v31 = vadd.f32 1.0, %v1473_v28 }
 0x1c8   : > { %v1477_v32 = vpop.eup %1476  ;;  %1496 = vrcp.f32 %v953_v29  ;;  %v959_v33 = vadd.f32 1.0, %v1475_v30 }
 0x1c9   : > { %v1479_v35 = vpop.eup %1478  ;;  %1498 = vrcp.f32 %v957_v31  ;;  %v958_v36 = vadd.f32 1.0, %v1477_v32 }
 0x1ca   : > { %v1481_v37 = vpop.eup %1480  ;;  %1500 = vrcp.f32 %v959_v33  ;;  %v960_v38 = vadd.f32 1.0, %v1479_v35 }
 0x1cb   : > { %v1483_v42 = vpop.eup %1482  ;;  %1502 = vrcp.f32 %v958_v36  ;;  %v964_v45 = vadd.f32 1.0, %v1481_v37 }
 0x1cc   : > { %v1485_v51 = vpop.eup %1484  ;;  %1504 = vrcp.f32 %v960_v38  ;;  %v966_v47 = vadd.f32 1.0, %v1483_v42 }
 0x1cd   : > { %v1487_v54 = vpop.eup %1486  ;;  %1506 = vrcp.f32 %v964_v45  ;;  %v965_v55 = vadd.f32 1.0, %v1485_v51 }
 0x1ce   : > { %v1489_v39 = vpop.eup %1488  ;;  %1508 = vrcp.f32 %v966_v47  ;;  %v967_v48 = vadd.f32 1.0, %v1487_v54 }
 0x1cf   : > { %v1491_v57 = vpop.eup %1490  ;;  %1510 = vrcp.f32 %v965_v55  ;;  %v971_v44 = vadd.f32 1.0, %v1489_v39 }
 0x1d0   : > { %v1493_v59 = vpop.eup %1492  ;;  %1034 = vst [vmem:[%s1891_s23] sm:$0xff] %v1491_v57  ;;  %1512 = vrcp.f32 %v967_v48 }
 0x1d1   : > { %v1495_v61 = vpop.eup %1494  ;;  %1036 = vst [vmem:[%s1891_s23 + $0x10] sm:$0xff] %v1493_v59  ;;  %1514 = vrcp.f32 %v971_v44 }
 0x1d2   : > { %v1497_v63 = vpop.eup %1496  ;;  %1035 = vst [vmem:[%s1891_s23 + $0x8] sm:$0xff] %v1495_v61  ;;  %1516 = vpow2.f32 %v1188_v56 }
 0x1d3   : > { %v1499_v0 = vpop.eup %1498  ;;  %1037 = vst [vmem:[%s1891_s23 + $0x18] sm:$0xff] %v1497_v63  ;;  %1518 = vpow2.f32 %v1187_v58  ;;  %v693_v1 = vpop.f32.mrb[8].mxu0 }
 0x1d4   : > { %v1252_v2 = vpop.f32.mrb[8].mxu1  ;;  %v1501_v3 = vpop.eup %1500  ;;  %1042 = vst [vmem:[%s1891_s23 + $0x38] sm:$0xff] %v1499_v0  ;;  %1520 = vpow2.f32 %v1189_v40  ;;  %v842_v4 = vadd.f32 %v1895_v46, %v693_v1 }
 0x1d5   : > { %v851_v5 = vadd.f32 %v1252_v2, %v830_v60  ;;  %v695_v6 = vpop.f32.mrb[9].mxu0  ;;  %v782_v34 = vpop.f32.mrb[9].mxu1  ;;  %1044 = vst [vmem:[%s1891_s23 + $0x48] sm:$0xff] %v1501_v3 }
 0x1d6   : > { %v1503_v7 = vpop.eup %1502  ;;  %v843_v8 = vadd.f32 %v1900_v62, %v695_v6  ;;  %v844_v9 = vadd.f32 %v830_v60, %v782_v34  ;;  %v1169_v11 = vmul.f32 -1.442695, %v842_v4 }
 0x1d7   : > { %v1505_v10 = vpop.eup %1504  ;;  %1043 = vst [vmem:[%s1891_s23 + $0x40] sm:$0xff] %v1503_v7  ;;  %v1178_v12 = vmul.f32 -1.442695, %v851_v5  ;;  %v699_v16 = vpop.f32.mrb[10].mxu0 }
 0x1d8   : > { %v1507_v13 = vpop.eup %1506  ;;  %1045 = vst [vmem:[%s1891_s23 + $0x50] sm:$0xff] %v1505_v10  ;;  %v1170_v14 = vmul.f32 -1.442695, %v843_v8  ;;  %v1171_v15 = vmul.f32 -1.442695, %v844_v9  ;;  %v1255_v17 = vpop.f32.mrb[10].mxu1  ;;  %1522 = vpow2.f32 %v1169_v11  ;;  %v849_v19 = vadd.f32 %v1895_v46, %v699_v16 }
 0x1d9   : > { %v1509_v18 = vpop.eup %1508  ;;  %1049 = vst [vmem:[%s1891_s23 + $0x70] sm:$0xff] %v1507_v13  ;;  %v865_v20 = vadd.f32 %v1255_v17, %v830_v60  ;;  %v701_v21 = vpop.f32.mrb[11].mxu0  ;;  %1524 = vpow2.f32 %v1178_v12 }
 0x1da   : > { %v792_v22 = vpop.f32.mrb[11].mxu1  ;;  %v1511_v23 = vpop.eup %1510  ;;  %1051 = vst [vmem:[%s1891_s23 + $0x80] sm:$0xff] %v1509_v18  ;;  %v850_v24 = vadd.f32 %v1900_v62, %v701_v21  ;;  %1526 = vpow2.f32 %v1170_v14  ;;  %v1176_v26 = vmul.f32 -1.442695, %v849_v19 }
 0x1db   : > { %v1513_v25 = vpop.eup %1512  ;;  %1050 = vst [vmem:[%s1891_s23 + $0x78] sm:$0xff] %v1511_v23  ;;  %v1192_v27 = vmul.f32 -1.442695, %v865_v20  ;;  %v858_v28 = vadd.f32 %v830_v60, %v792_v22  ;;  %1528 = vpow2.f32 %v1171_v15  ;;  %v705_v31 = vpop.f32.mrb[12].mxu0 }
 0x1dc   : > { %v1515_v29 = vpop.eup %1514  ;;  %1052 = vst [vmem:[%s1891_s23 + $0x88] sm:$0xff] %v1513_v25  ;;  %v1177_v30 = vmul.f32 -1.442695, %v850_v24  ;;  %1530 = vpow2.f32 %v1176_v26  ;;  %v856_v33 = vadd.f32 %v1895_v46, %v705_v31  ;;  %v707_v35 = vpop.f32.mrb[13].mxu0 }
 0x1dd   : > { %v1517_v32 = vpop.eup %1516  ;;  %1056 = vst [vmem:[%s1891_s23 + $0xa8] sm:$0xff] %v1515_v29  ;;  %1532 = vpow2.f32 %v1192_v27  ;;  %v857_v38 = vadd.f32 %v1900_v62, %v707_v35  ;;  %v1185_v45 = vmul.f32 -1.442695, %v858_v28 }
 0x1de   : > { %v1519_v36 = vpop.eup %1518  ;;  %v973_v37 = vadd.f32 1.0, %v1517_v32  ;;  %1534 = vpow2.f32 %v1177_v30  ;;  %v1183_v50 = vmul.f32 -1.442695, %v856_v33 }
 0x1df   : > { %v1521_v41 = vpop.eup %1520  ;;  %v972_v42 = vadd.f32 1.0, %v1519_v36  ;;  %v711_v51 = vpop.f32.mrb[14].mxu0  ;;  %v1184_v47 = vmul.f32 -1.442695, %v857_v38 }
 0x1e0   : > { %1536 = vrcp.f32 %v973_v37  ;;  %v974_v49 = vadd.f32 1.0, %v1521_v41  ;;  %v713_v52 = vpop.f32.mrb[15].mxu0  ;;  %v863_v48 = vadd.f32 %v1895_v46, %v711_v51 }
 0x1e1   : > { %1538 = vrcp.f32 %v972_v42  ;;  %v864_v44 = vadd.f32 %v1900_v62, %v713_v52 }
 0x1e2   : > { %1540 = vrcp.f32 %v974_v49  ;;  %v1523_v53 = vpop.eup %1522  ;;  %v1190_v0 = vmul.f32 -1.442695, %v863_v48 }
 0x1e3   : > { %1542 = vpow2.f32 %v1185_v45  ;;  %v1525_v54 = vpop.eup %1524  ;;  %v954_v55 = vadd.f32 1.0, %v1523_v53  ;;  %v1191_v2 = vmul.f32 -1.442695, %v864_v44 }
 0x1e4   : > { %1544 = vpow2.f32 %v1183_v50  ;;  %v1527_v43 = vpop.eup %1526  ;;  %v963_v39 = vadd.f32 1.0, %v1525_v54 }
 0x1e5   : > { %1546 = vpow2.f32 %v1184_v47  ;;  %v1529_v56 = vpop.eup %1528  ;;  %v955_v57 = vadd.f32 1.0, %v1527_v43 }
 0x1e6   : > { %1548 = vrcp.f32 %v954_v55  ;;  %v1531_v58 = vpop.eup %1530  ;;  %v956_v59 = vadd.f32 1.0, %v1529_v56 }
 0x1e7   : > { %1550 = vrcp.f32 %v963_v39  ;;  %v1533_v40 = vpop.eup %1532  ;;  %v961_v60 = vadd.f32 1.0, %v1531_v58 }
 0x1e8   : > { %1552 = vrcp.f32 %v955_v57  ;;  %v1535_v61 = vpop.eup %1534  ;;  %v977_v63 = vadd.f32 1.0, %v1533_v40 }
 0x1e9   : > { %1554 = vrcp.f32 %v956_v59  ;;  %v962_v46 = vadd.f32 1.0, %v1535_v61 }
 0x1ea   : > { %v1537_v1 = vpop.eup %1536  ;;  %1556 = vrcp.f32 %v961_v60 }
 0x1eb   : > { %v1539_v3 = vpop.eup %1538  ;;  %1058 = vst [vmem:[%s1891_s23 + $0xb8] sm:$0xff] %v1537_v1  ;;  %1558 = vrcp.f32 %v977_v63 }
 0x1ec   : > { %v1541_v62 = vpop.eup %1540  ;;  %1057 = vst [vmem:[%s1891_s23 + $0xb0] sm:$0xff] %v1539_v3  ;;  %1560 = vrcp.f32 %v962_v46 }
 0x1ed   : > { %v1543_v4 = vpop.eup %1542  ;;  %1059 = vst [vmem:[%s1891_s23 + $0xc0] sm:$0xff] %v1541_v62  ;;  %1562 = vpow2.f32 %v1190_v0 }
 0x1ee   : > { %v1545_v5 = vpop.eup %1544  ;;  %v970_v6 = vadd.f32 1.0, %v1543_v4  ;;  %1564 = vpow2.f32 %v1191_v2 }
 0x1ef   : > { %v1547_v34 = vpop.eup %1546  ;;  %v968_v7 = vadd.f32 1.0, %v1545_v5 }
 0x1f0   : > { %v1549_v8 = vpop.eup %1548  ;;  %1566 = vrcp.f32 %v970_v6  ;;  %v969_v9 = vadd.f32 1.0, %v1547_v34 }
 0x1f1   : > { %v1551_v10 = vpop.eup %1550  ;;  %1038 = vst [vmem:[%s1891_s23 + $0x20] sm:$0xff] %v1549_v8  ;;  %1568 = vrcp.f32 %v968_v7 }
 0x1f2   : > { %v1553_v11 = vpop.eup %1552  ;;  %1048 = vst.msk [vmem:[%s1891_s23 + $0x68] sm:$0xff] %vm1040_vm0, %v1551_v10  ;;  %1570 = vrcp.f32 %v969_v9 }
 0x1f3   : > { %v1555_v12 = vpop.eup %1554  ;;  %1039 = vst [vmem:[%s1891_s23 + $0x28] sm:$0xff] %v1553_v11 }
 0x1f4   : > { %v1557_v13 = vpop.eup %1556  ;;  %1041 = vst.msk [vmem:[%s1891_s23 + $0x30] sm:$0xff] %vm1040_vm0, %v1555_v12 }
 0x1f5   : > { %v1559_v14 = vpop.eup %1558  ;;  %1046 = vst [vmem:[%s1891_s23 + $0x58] sm:$0xff] %v1557_v13 }
 0x1f6   : > { %v1561_v15 = vpop.eup %1560  ;;  %1062 = vst.msk [vmem:[%s1891_s23 + $0xd8] sm:$0xff] %vm1040_vm0, %v1559_v14 }
 0x1f7   : > { %v1563_v16 = vpop.eup %1562  ;;  %1047 = vst [vmem:[%s1891_s23 + $0x60] sm:$0xff] %v1561_v15 }
 0x1f8   : > { %v1565_v17 = vpop.eup %1564  ;;  %v975_v18 = vadd.f32 1.0, %v1563_v16 }
 0x1f9   : > { %v976_v19 = vadd.f32 1.0, %v1565_v17 }
 0x1fa   : > { %v1567_v20 = vpop.eup %1566  ;;  %1572 = vrcp.f32 %v975_v18 }
 0x1fb   : > { %v1569_v21 = vpop.eup %1568  ;;  %1055 = vst.msk [vmem:[%s1891_s23 + $0xa0] sm:$0xff] %vm1040_vm0, %v1567_v20  ;;  %1574 = vrcp.f32 %v976_v19 }
 0x1fc   : > { %v1571_v22 = vpop.eup %1570  ;;  %1053 = vst [vmem:[%s1891_s23 + $0x90] sm:$0xff] %v1569_v21 }
 0x1fd   : > { %1054 = vst [vmem:[%s1891_s23 + $0x98] sm:$0xff] %v1571_v22 }
 0x204   : > { %v1573_v23 = vpop.eup %1572 }
 0x205   : > { %v1575_v24 = vpop.eup %1574  ;;  %1060 = vst [vmem:[%s1891_s23 + $0xc8] sm:$0xff] %v1573_v23 }
 0x206   : > { %1061 = vst [vmem:[%s1891_s23 + $0xd0] sm:$0xff] %v1575_v24 }
 0x207   : > { %1617 = shalt.err (!%p1614_p7)
}
 0x208   : > { %s1618_s12 = scalar_lea.hbm %s1945_s9, 3584  ;;  %s1622_s15 = scalar_lea.hbm %s1997_s5, 7168 }
 0x209   : > { %p1619_p8 = scmp.ne.s32.totalorder %s1945_s9, %s1618_s12  ;;  %p1623_p1 = scmp.lt.u32.totalorder %s1945_s9, %s1997_s5 }
 0x20a   : > { %p1624_p0 = scmp.lt.u32.totalorder %s1622_s15, %s1618_s12  ;;  %p1626_p6 = scmp.lt.u32.totalorder %s1618_s12, %s1945_s9 }
 0x20b   : > { %p1620_p11 = pnand %p1619_p8, %p2008_p9 }
 0x20c   : > { %p1625_p5 = por %p1624_p0, %p1623_p1 }
 0x20d   : > { %p1621_p13 = pneg %p1620_p11 }
 0x20e   : > { %p1627_p10 = por %p1626_p6, %p1625_p5 }
 0x210   : > { %p1628_p12 = pnand %p1627_p10, %p1621_p13 }
 0x212   : > { %1631 = shalt.err (!%p1628_p12)
}
 0x213   : > { %s1679_s23 = smov 896   ;;  %s1680_s25 = smov 56  }
 0x214   : > { %1390 = dma.vmem_to_hbm [thread:$0]  (%p2008_p9), %s1940_s26, 3584, %s1945_s9, %s1951_s10, %s1679_s23, %s1679_s23, %s1680_s25  }
 0x215 PF: > { %p1402_p2 = scmp.ge.s32.totalorder %s1670_s21, 2  ;;  %s1093_s6 = sand.u32 1, %s1658_s18  }
 0x216   : > { %p2009_p3 = scmp.ne.s32.totalorder %s2002_s29, 0  ;;  %s1094_s8 = scalar_lea.sflag [#allocation4], %s1093_s6 }
 0x218   : > { %p1397_p4 = pnand %p1402_p2, %p2009_p3 }
 0x21a   : > { %1653 = dma.done.wait (!%p1397_p4), %s1094_s8, 3584  }
 0x21b   : > { %1655 = vsyncadd (!%p1397_p4), %s1094_s8, 4294963712  ;;  %p16_p7 = scmp.ge.s32.totalorder %s1736_s24, 4   ;;  %s2010_s18 = smov %s1662_s19 }
 0x21c   : > { %s2011_s19 = smov %s1666_s20  ;;  %s2012_s20 = smov %s1747_s27 }
 0x21d   : > { %s2013_s21 = smov %s1736_s24  ;;  %18 = sbr.rel (!%p16_p7) target bundleno = 4 (0x4), region = 80 }
 0x224   :  { %1099 = vsyncpa [#allocation3], 1 }
 0x225   :  { %1101 = vsyncpa [#allocation3 + $0x1], 1 }
 0x226   :  { %1102 = vsyncpa [#allocation4], 1 }
 0x227   :  { %1104 = vsyncpa [#allocation4 + $0x1], 1 }

</bundles_post_ra>
